<compile_context>
chip_gen: v5e
topology: v5e:2x2
jax: 0.10.0
libtpu: 0.0.40
codegen_flags: <defaults>
</compile_context>

<pallas_src>
import jax
import jax.numpy as jnp
from jax.experimental import pallas as pl
from jax.experimental.pallas import tpu as pltpu


def _round_up(n, m):
    return ((n + m - 1) // m) * m


def _device_kind():
    try:
        return jax.devices()[0].device_kind.lower()
    except Exception:
        return ""


def _default_tanh_dtype():
    """bf16 tanh on v6e/v7x (bf16 EUP); f32 on v5e and older (no bf16 EUP/VPU)."""
    kind = _device_kind()
    if ("v6" in kind) or ("v7" in kind) or ("7x" in kind):
        return jnp.bfloat16
    return jnp.float32


def _vmem_cap_bytes():
    """Per-generation VMEM cap: leave scratch headroom on v7x (64 MiB physical)."""
    kind = _device_kind()
    if "7" in kind:
        return 48 << 20
    return 100 << 20          # v5e / v6e have 128 MiB physical VMEM


def _make_mlp_kernel(in_dim, num_linear, tanh_dtype, compute_dtype):
    """Fused (num_linear)-layer MLP forward for one batch tile."""

    def kernel(*refs):
        x_ref = refs[0]                       # (bt, in_dim) f32, unpadded lanes
        w0_ref = refs[1]                      # (in_dim, hid_p) f32
        wh_refs = refs[2:1 + num_linear]      # bf16, (hid_p, hid_p/out_p)
        b_ref = refs[1 + num_linear]          # (num_linear, b_p) f32, stacked biases
        o_ref = refs[2 + num_linear]          # (bt, out_p) f32

        hid_p = w0_ref.shape[1]

        # ---- Layer 0: in_dim rank-1 VPU FMAs in f32 (no K-padding of x needed). ----
        x = x_ref[...]
        w0 = w0_ref[...]
        z = x[:, 0:1] * w0[0:1, :]
        for k in range(1, in_dim):
            z = z + x[:, k:k + 1] * w0[k:k + 1, :]
        z = z + b_ref[0:1, :hid_p]
        h = jnp.tanh(z.astype(tanh_dtype)).astype(compute_dtype)

        # ---- Hidden + output layers: bf16 MXU matmuls with f32 accumulation. ----
        for li, w_ref in enumerate(wh_refs, start=1):
            do = w_ref.shape[1]
            z = jnp.dot(h, w_ref[...], preferred_element_type=jnp.float32)
            z = z + b_ref[li:li + 1, :do]                   # f32 bias add
            if li < num_linear - 1:
                # Tanh (Dropout after it is identity at inference).
                h = jnp.tanh(z.astype(tanh_dtype)).astype(compute_dtype)
            else:
                h = z                                       # final Linear: no tanh
        o_ref[...] = h.astype(o_ref.dtype)

    return kernel


def net_forward(x, params, *, batch_tile=2048, compute_dtype=jnp.bfloat16,
                tanh_dtype=None):
    """Run the fused MLP. x: [B, in_dim] f32. params: list of (W[in,out], b[out])."""
    if tanh_dtype is None:
        tanh_dtype = _default_tanh_dtype()

    B, in_dim = x.shape
    num = len(params)
    hid = params[0][0].shape[1]
    out_dim = params[-1][0].shape[1]

    hid_p = _round_up(hid, 128)
    out_p = _round_up(out_dim, 128)
    b_p = max(hid_p, out_p)

    # ---- Batch tiling: large MXU-aligned tiles, but guarantee >= 2 grid steps when
    # the batch permits so the "parallel" axis can span both TensorCores on v7x. ----
    bt = min(batch_tile, _round_up(B, 8))
    bt = _round_up(bt, 8)
    B_pad = _round_up(B, bt)
    if B_pad // bt < 2 and _round_up(B, 8) >= 16:
        bt = max(8, ((_round_up(B, 8) // 2) // 8) * 8)
        B_pad = _round_up(B, bt)

    # ---- Input: pad batch rows only (no lane padding / dtype cast in HBM). ----
    x = x.astype(jnp.float32)
    x_in = x if B_pad == B else jnp.pad(x, ((0, B_pad - B), (0, 0)))

    # ---- Weights: layer 0 stays f32 (VPU FMA path); rest are lane-padded bf16. ----
    w0, b0 = params[0]
    w0_p = jnp.zeros((in_dim, hid_p), jnp.float32).at[:, :hid].set(
        w0.astype(jnp.float32))
    bias_stack = jnp.zeros((num, b_p), jnp.float32).at[0, :hid].set(
        b0.astype(jnp.float32))
    w_rest = []
    for li in range(1, num):
        w, b = params[li]
        di, do = w.shape
        do_p = out_p if li == num - 1 else hid_p
        wp = jnp.zeros((hid_p, do_p), compute_dtype).at[:di, :do].set(
            w.astype(compute_dtype))
        w_rest.append(wp)
        bias_stack = bias_stack.at[li, :do].set(b.astype(jnp.float32))
    weights = [w0_p] + w_rest

    kernel = _make_mlp_kernel(in_dim, num, tanh_dtype, compute_dtype)

    # ---- VMEM budget (conservative: double-buffered everything + activations). ----
    wt_bytes = sum(int(w.size) * w.dtype.itemsize for w in weights)
    io_bytes = bt * in_dim * 4 + bt * out_p * 4
    est = 2 * (wt_bytes + io_bytes + num * b_p * 4) + 6 * bt * max(hid_p, out_p) * 4
    vmem_limit = int(min(_vmem_cap_bytes(), max(32 << 20, 2 * est)))

    def build(single_buffer_invariants):
        inv_kw = ({"pipeline_mode": pl.Buffered(1)}
                  if single_buffer_invariants else {})
        in_specs = [pl.BlockSpec((bt, in_dim), lambda i: (i, 0))]
        # Grid-invariant weights / biases: constant index_map, whole-array blocks,
        # single-buffered (they never change, double-buffering only wastes VMEM).
        in_specs += [pl.BlockSpec(w.shape, lambda i: (0, 0), **inv_kw)
                     for w in weights]
        in_specs.append(pl.BlockSpec((num, b_p), lambda i: (0, 0), **inv_kw))
        out_spec = pl.BlockSpec((bt, out_p), lambda i: (i, 0))
        return pl.pallas_call(
            kernel,
            out_shape=jax.ShapeDtypeStruct((B_pad, out_p), jnp.float32),
            grid_spec=pltpu.PrefetchScalarGridSpec(
                num_scalar_prefetch=0,
                grid=(B_pad // bt,),
                in_specs=in_specs,
                out_specs=out_spec,
            ),
            compiler_params=pltpu.CompilerParams(
                dimension_semantics=("parallel",),
                vmem_limit_bytes=vmem_limit),
        )

    try:
        out = jax.block_until_ready(build(True)(x_in, *weights, bias_stack))
    except Exception:
        # Fallback if this JAX build rejects pipeline_mode on grid-invariant specs.
        out = build(False)(x_in, *weights, bias_stack)

    # Slice the real batch rows / output features out of the lane-dense result.
    return out[:B, :out_dim]


def init_params(key, in_dim, out_dim, hid_dim, num_layers=4):
    """Deterministic init mimicking nn.Linear's U(-1/sqrt(fan_in), 1/sqrt(fan_in))."""
    dims = [in_dim] + [hid_dim] * num_layers + [out_dim]
    params = []
    for i in range(len(dims) - 1):
        key, kw, kb = jax.random.split(key, 3)
        bound = 1.0 / float(jnp.sqrt(jnp.float32(dims[i])))
        # Stored as [in_features, out_features] (transposed vs. PyTorch).
        w = jax.random.uniform(kw, (dims[i], dims[i + 1]),
                               minval=-bound, maxval=bound, dtype=jnp.float32)
        b = jax.random.uniform(kb, (dims[i + 1],),
                               minval=-bound, maxval=bound, dtype=jnp.float32)
        params.append((w, b))
    return params


def reference_forward(x, params, compute_dtype=jnp.bfloat16, tanh_dtype=jnp.float32):
    """Pure-JAX reference using the same mixed-precision arithmetic as the kernel."""
    n = len(params)
    w0, b0 = params[0]
    z = jnp.dot(x.astype(jnp.float32), w0.astype(jnp.float32),
                preferred_element_type=jnp.float32) + b0.astype(jnp.float32)
    h = jnp.tanh(z.astype(tanh_dtype)).astype(compute_dtype)
    for li in range(1, n):
        w, b = params[li]
        z = jnp.dot(h, w.astype(compute_dtype),
                    preferred_element_type=jnp.float32) + b.astype(jnp.float32)
        if li < n - 1:
            h = jnp.tanh(z.astype(tanh_dtype)).astype(compute_dtype)
        else:
            h = z
    return h


if __name__ == "__main__":
    key = jax.random.PRNGKey(0)
    in_dim, out_dim, hid_dim = 4, 2, 50              # module defaults (hid_dim=50)
    kx, kx2, kp = jax.random.split(key, 3)
    params = init_params(kp, in_dim, out_dim, hid_dim, num_layers=4)
    tanh_dtype = _default_tanh_dtype()

    # Small-batch check (tile shrinks to 8 rows; grid of 2 steps).
    x = jax.random.normal(kx, (16, in_dim), dtype=jnp.float32)
    out = jax.block_until_ready(net_forward(x, params))
    ref = reference_forward(x, params, tanh_dtype=tanh_dtype)
    assert out.shape == (16, out_dim)
    assert jnp.allclose(out, ref, atol=1e-2, rtol=1e-2), "mismatch vs reference (small)"

    # Larger batch: exercises the >=2-step grid rule (bt=256, grid=(2,)).
    x2 = jax.random.normal(kx2, (512, in_dim), dtype=jnp.float32)
    out2 = jax.block_until_ready(net_forward(x2, params))
    ref2 = reference_forward(x2, params, tanh_dtype=tanh_dtype)
    assert out2.shape == (512, out_dim)
    assert jnp.allclose(out2, ref2, atol=1e-2, rtol=1e-2), "mismatch vs reference (tiled)"

    print("KERNEL_OK")
</pallas_src>

<mosaic_0001>
module attributes {stable_mosaic.version = 11 : i64} {
  func.func @kernel(%arg0: i32, %arg1: memref<8x4xf32, #tpu.memory_space<vmem>>, %arg2: memref<4x128xf32, #tpu.memory_space<vmem>>, %arg3: memref<128x128xbf16, #tpu.memory_space<vmem>>, %arg4: memref<128x128xbf16, #tpu.memory_space<vmem>>, %arg5: memref<128x128xbf16, #tpu.memory_space<vmem>>, %arg6: memref<128x128xbf16, #tpu.memory_space<vmem>>, %arg7: memref<5x128xf32, #tpu.memory_space<vmem>>, %arg8: memref<8x128xf32, #tpu.memory_space<vmem>>) attributes {dimension_semantics = [#tpu.dimension_semantics<parallel>], iteration_bounds = array<i64: 2>, scalar_prefetch = 0 : i64, scratch_operands = 0 : i64, tpu.core_type = #tpu.core_type<tc>, window_params = [{transform_indices = @transform_0, window_bounds = array<i64: 8, 4>}, {pipeline_mode = #tpu.pipeline_mode<synchronous>, transform_indices = @transform_1, window_bounds = array<i64: 4, 128>}, {pipeline_mode = #tpu.pipeline_mode<synchronous>, transform_indices = @transform_2, window_bounds = array<i64: 128, 128>}, {pipeline_mode = #tpu.pipeline_mode<synchronous>, transform_indices = @transform_3, window_bounds = array<i64: 128, 128>}, {pipeline_mode = #tpu.pipeline_mode<synchronous>, transform_indices = @transform_4, window_bounds = array<i64: 128, 128>}, {pipeline_mode = #tpu.pipeline_mode<synchronous>, transform_indices = @transform_5, window_bounds = array<i64: 128, 128>}, {pipeline_mode = #tpu.pipeline_mode<synchronous>, transform_indices = @transform_6, window_bounds = array<i64: 5, 128>}, {transform_indices = @transform_7, window_bounds = array<i64: 8, 128>}]} {
    %c0 = arith.constant 0 : index
    %c0_0 = arith.constant 0 : index
    %0 = vector.load %arg1[%c0, %c0_0] : memref<8x4xf32, #tpu.memory_space<vmem>>, vector<8x4xf32>
    %c0_1 = arith.constant 0 : index
    %c0_2 = arith.constant 0 : index
    %1 = vector.load %arg2[%c0_1, %c0_2] : memref<4x128xf32, #tpu.memory_space<vmem>>, vector<4x128xf32>
    %2 = vector.extract_strided_slice %0 {offsets = [0, 0], sizes = [8, 1], strides = [1, 1]} : vector<8x4xf32> to vector<8x1xf32>
    %3 = vector.extract_strided_slice %1 {offsets = [0, 0], sizes = [1, 128], strides = [1, 1]} : vector<4x128xf32> to vector<1x128xf32>
    %4 = vector.broadcast %2 : vector<8x1xf32> to vector<8x128xf32>
    %5 = vector.broadcast %3 : vector<1x128xf32> to vector<8x128xf32>
    %6 = arith.mulf %4, %5 : vector<8x128xf32>
    %7 = vector.extract_strided_slice %0 {offsets = [0, 1], sizes = [8, 1], strides = [1, 1]} : vector<8x4xf32> to vector<8x1xf32>
    %8 = vector.extract_strided_slice %1 {offsets = [1, 0], sizes = [1, 128], strides = [1, 1]} : vector<4x128xf32> to vector<1x128xf32>
    %9 = vector.broadcast %7 : vector<8x1xf32> to vector<8x128xf32>
    %10 = vector.broadcast %8 : vector<1x128xf32> to vector<8x128xf32>
    %11 = arith.mulf %9, %10 : vector<8x128xf32>
    %12 = arith.addf %6, %11 : vector<8x128xf32>
    %13 = vector.extract_strided_slice %0 {offsets = [0, 2], sizes = [8, 1], strides = [1, 1]} : vector<8x4xf32> to vector<8x1xf32>
    %14 = vector.extract_strided_slice %1 {offsets = [2, 0], sizes = [1, 128], strides = [1, 1]} : vector<4x128xf32> to vector<1x128xf32>
    %15 = vector.broadcast %13 : vector<8x1xf32> to vector<8x128xf32>
    %16 = vector.broadcast %14 : vector<1x128xf32> to vector<8x128xf32>
    %17 = arith.mulf %15, %16 : vector<8x128xf32>
    %18 = arith.addf %12, %17 : vector<8x128xf32>
    %19 = vector.extract_strided_slice %0 {offsets = [0, 3], sizes = [8, 1], strides = [1, 1]} : vector<8x4xf32> to vector<8x1xf32>
    %20 = vector.extract_strided_slice %1 {offsets = [3, 0], sizes = [1, 128], strides = [1, 1]} : vector<4x128xf32> to vector<1x128xf32>
    %21 = vector.broadcast %19 : vector<8x1xf32> to vector<8x128xf32>
    %22 = vector.broadcast %20 : vector<1x128xf32> to vector<8x128xf32>
    %23 = arith.mulf %21, %22 : vector<8x128xf32>
    %24 = arith.addf %18, %23 : vector<8x128xf32>
    %c0_3 = arith.constant 0 : index
    %c0_4 = arith.constant 0 : index
    %25 = vector.load %arg7[%c0_3, %c0_4] : memref<5x128xf32, #tpu.memory_space<vmem>>, vector<1x128xf32>
    %26 = vector.broadcast %25 : vector<1x128xf32> to vector<8x128xf32>
    %27 = arith.addf %24, %26 : vector<8x128xf32>
    %28 = math.tanh %27 : vector<8x128xf32>
    %29 = arith.truncf %28 : vector<8x128xf32> to vector<8x128xbf16>
    %c0_5 = arith.constant 0 : index
    %c0_6 = arith.constant 0 : index
    %30 = vector.load %arg3[%c0_5, %c0_6] : memref<128x128xbf16, #tpu.memory_space<vmem>>, vector<128x128xbf16>
    %cst = arith.constant dense<0.000000e+00> : vector<8x128xf32>
    %31 = tpu.matmul %29, %30, %cst {dimension_numbers = #tpu.dot_dimension_numbers<[1], [0], [0], [1], [0, 0, 1, 1], [], []>} : vector<8x128xbf16>, vector<128x128xbf16>, vector<8x128xf32> -> vector<8x128xf32>
    %c1 = arith.constant 1 : index
    %c0_7 = arith.constant 0 : index
    %32 = vector.load %arg7[%c1, %c0_7] : memref<5x128xf32, #tpu.memory_space<vmem>>, vector<1x128xf32>
    %33 = vector.broadcast %32 : vector<1x128xf32> to vector<8x128xf32>
    %34 = arith.addf %31, %33 : vector<8x128xf32>
    %35 = math.tanh %34 : vector<8x128xf32>
    %36 = arith.truncf %35 : vector<8x128xf32> to vector<8x128xbf16>
    %c0_8 = arith.constant 0 : index
    %c0_9 = arith.constant 0 : index
    %37 = vector.load %arg4[%c0_8, %c0_9] : memref<128x128xbf16, #tpu.memory_space<vmem>>, vector<128x128xbf16>
    %cst_10 = arith.constant dense<0.000000e+00> : vector<8x128xf32>
    %38 = tpu.matmul %36, %37, %cst_10 {dimension_numbers = #tpu.dot_dimension_numbers<[1], [0], [0], [1], [0, 0, 1, 1], [], []>} : vector<8x128xbf16>, vector<128x128xbf16>, vector<8x128xf32> -> vector<8x128xf32>
    %c2 = arith.constant 2 : index
    %c0_11 = arith.constant 0 : index
    %39 = vector.load %arg7[%c2, %c0_11] : memref<5x128xf32, #tpu.memory_space<vmem>>, vector<1x128xf32>
    %40 = vector.broadcast %39 : vector<1x128xf32> to vector<8x128xf32>
    %41 = arith.addf %38, %40 : vector<8x128xf32>
    %42 = math.tanh %41 : vector<8x128xf32>
    %43 = arith.truncf %42 : vector<8x128xf32> to vector<8x128xbf16>
    %c0_12 = arith.constant 0 : index
    %c0_13 = arith.constant 0 : index
    %44 = vector.load %arg5[%c0_12, %c0_13] : memref<128x128xbf16, #tpu.memory_space<vmem>>, vector<128x128xbf16>
    %cst_14 = arith.constant dense<0.000000e+00> : vector<8x128xf32>
    %45 = tpu.matmul %43, %44, %cst_14 {dimension_numbers = #tpu.dot_dimension_numbers<[1], [0], [0], [1], [0, 0, 1, 1], [], []>} : vector<8x128xbf16>, vector<128x128xbf16>, vector<8x128xf32> -> vector<8x128xf32>
    %c3 = arith.constant 3 : index
    %c0_15 = arith.constant 0 : index
    %46 = vector.load %arg7[%c3, %c0_15] : memref<5x128xf32, #tpu.memory_space<vmem>>, vector<1x128xf32>
    %47 = vector.broadcast %46 : vector<1x128xf32> to vector<8x128xf32>
    %48 = arith.addf %45, %47 : vector<8x128xf32>
    %49 = math.tanh %48 : vector<8x128xf32>
    %50 = arith.truncf %49 : vector<8x128xf32> to vector<8x128xbf16>
    %c0_16 = arith.constant 0 : index
    %c0_17 = arith.constant 0 : index
    %51 = vector.load %arg6[%c0_16, %c0_17] : memref<128x128xbf16, #tpu.memory_space<vmem>>, vector<128x128xbf16>
    %cst_18 = arith.constant dense<0.000000e+00> : vector<8x128xf32>
    %52 = tpu.matmul %50, %51, %cst_18 {dimension_numbers = #tpu.dot_dimension_numbers<[1], [0], [0], [1], [0, 0, 1, 1], [], []>} : vector<8x128xbf16>, vector<128x128xbf16>, vector<8x128xf32> -> vector<8x128xf32>
    %c4 = arith.constant 4 : index
    %c0_19 = arith.constant 0 : index
    %53 = vector.load %arg7[%c4, %c0_19] : memref<5x128xf32, #tpu.memory_space<vmem>>, vector<1x128xf32>
    %54 = vector.broadcast %53 : vector<1x128xf32> to vector<8x128xf32>
    %55 = arith.addf %52, %54 : vector<8x128xf32>
    %c0_20 = arith.constant 0 : index
    %c0_21 = arith.constant 0 : index
    %56 = vector.load %arg8[%c0_20, %c0_21] : memref<8x128xf32, #tpu.memory_space<vmem>>, vector<8x128xf32>
    tpu.vector_store %arg8[%c0_20, %c0_21], %55 {strides = array<i32>} : memref<8x128xf32, #tpu.memory_space<vmem>>, vector<8x128xf32>,
    return
  }
  func.func @transform_0(%arg0: i32) -> (i32, i32) {
    %c0_i32 = arith.constant 0 : i32
    %c0_i32_0 = arith.constant 0 : i32
    return %arg0, %c0_i32 : i32, i32
  }
  func.func @transform_1(%arg0: i32) -> (i32, i32) {
    %c0_i32 = arith.constant 0 : i32
    %c0_i32_0 = arith.constant 0 : i32
    %c0_i32_1 = arith.constant 0 : i32
    return %c0_i32, %c0_i32_0 : i32, i32
  }
  func.func @transform_2(%arg0: i32) -> (i32, i32) {
    %c0_i32 = arith.constant 0 : i32
    %c0_i32_0 = arith.constant 0 : i32
    %c0_i32_1 = arith.constant 0 : i32
    return %c0_i32, %c0_i32_0 : i32, i32
  }
  func.func @transform_3(%arg0: i32) -> (i32, i32) {
    %c0_i32 = arith.constant 0 : i32
    %c0_i32_0 = arith.constant 0 : i32
    %c0_i32_1 = arith.constant 0 : i32
    return %c0_i32, %c0_i32_0 : i32, i32
  }
  func.func @transform_4(%arg0: i32) -> (i32, i32) {
    %c0_i32 = arith.constant 0 : i32
    %c0_i32_0 = arith.constant 0 : i32
    %c0_i32_1 = arith.constant 0 : i32
    return %c0_i32, %c0_i32_0 : i32, i32
  }
  func.func @transform_5(%arg0: i32) -> (i32, i32) {
    %c0_i32 = arith.constant 0 : i32
    %c0_i32_0 = arith.constant 0 : i32
    %c0_i32_1 = arith.constant 0 : i32
    return %c0_i32, %c0_i32_0 : i32, i32
  }
  func.func @transform_6(%arg0: i32) -> (i32, i32) {
    %c0_i32 = arith.constant 0 : i32
    %c0_i32_0 = arith.constant 0 : i32
    %c0_i32_1 = arith.constant 0 : i32
    return %c0_i32, %c0_i32_0 : i32, i32
  }
  func.func @transform_7(%arg0: i32) -> (i32, i32) {
    %c0_i32 = arith.constant 0 : i32
    %c0_i32_0 = arith.constant 0 : i32
    return %arg0, %c0_i32 : i32, i32
  }
}

module attributes {stable_mosaic.version = 11 : i64} {
  func.func @kernel(%arg0: i32, %arg1: memref<8x4xf32, #tpu.memory_space<vmem>>, %arg2: memref<4x128xf32, #tpu.memory_space<vmem>>, %arg3: memref<128x128xbf16, #tpu.memory_space<vmem>>, %arg4: memref<128x128xbf16, #tpu.memory_space<vmem>>, %arg5: memref<128x128xbf16, #tpu.memory_space<vmem>>, %arg6: memref<128x128xbf16, #tpu.memory_space<vmem>>, %arg7: memref<5x128xf32, #tpu.memory_space<vmem>>, %arg8: memref<8x128xf32, #tpu.memory_space<vmem>>) attributes {dimension_semantics = [#tpu.dimension_semantics<parallel>], iteration_bounds = array<i64: 2>, scalar_prefetch = 0 : i64, scratch_operands = 0 : i64, tpu.core_type = #tpu.core_type<tc>, window_params = [{transform_indices = @transform_0, window_bounds = array<i64: 8, 4>}, {pipeline_mode = #tpu.pipeline_mode<synchronous>, transform_indices = @transform_1, window_bounds = array<i64: 4, 128>}, {pipeline_mode = #tpu.pipeline_mode<synchronous>, transform_indices = @transform_2, window_bounds = array<i64: 128, 128>}, {pipeline_mode = #tpu.pipeline_mode<synchronous>, transform_indices = @transform_3, window_bounds = array<i64: 128, 128>}, {pipeline_mode = #tpu.pipeline_mode<synchronous>, transform_indices = @transform_4, window_bounds = array<i64: 128, 128>}, {pipeline_mode = #tpu.pipeline_mode<synchronous>, transform_indices = @transform_5, window_bounds = array<i64: 128, 128>}, {pipeline_mode = #tpu.pipeline_mode<synchronous>, transform_indices = @transform_6, window_bounds = array<i64: 5, 128>}, {transform_indices = @transform_7, window_bounds = array<i64: 8, 128>}]} {
    %c0 = arith.constant 0 : index
    %c0_0 = arith.constant 0 : index
    %0 = vector.load %arg1[%c0, %c0_0] : memref<8x4xf32, #tpu.memory_space<vmem>>, vector<8x4xf32>
    %c0_1 = arith.constant 0 : index
    %c0_2 = arith.constant 0 : index
    %1 = vector.load %arg2[%c0_1, %c0_2] : memref<4x128xf32, #tpu.memory_space<vmem>>, vector<4x128xf32>
    %2 = vector.extract_strided_slice %0 {offsets = [0, 0], sizes = [8, 1], strides = [1, 1]} : vector<8x4xf32> to vector<8x1xf32>
    %3 = vector.extract_strided_slice %1 {offsets = [0, 0], sizes = [1, 128], strides = [1, 1]} : vector<4x128xf32> to vector<1x128xf32>
    %4 = vector.broadcast %2 : vector<8x1xf32> to vector<8x128xf32>
    %5 = vector.broadcast %3 : vector<1x128xf32> to vector<8x128xf32>
    %6 = arith.mulf %4, %5 : vector<8x128xf32>
    %7 = vector.extract_strided_slice %0 {offsets = [0, 1], sizes = [8, 1], strides = [1, 1]} : vector<8x4xf32> to vector<8x1xf32>
    %8 = vector.extract_strided_slice %1 {offsets = [1, 0], sizes = [1, 128], strides = [1, 1]} : vector<4x128xf32> to vector<1x128xf32>
    %9 = vector.broadcast %7 : vector<8x1xf32> to vector<8x128xf32>
    %10 = vector.broadcast %8 : vector<1x128xf32> to vector<8x128xf32>
    %11 = arith.mulf %9, %10 : vector<8x128xf32>
    %12 = arith.addf %6, %11 : vector<8x128xf32>
    %13 = vector.extract_strided_slice %0 {offsets = [0, 2], sizes = [8, 1], strides = [1, 1]} : vector<8x4xf32> to vector<8x1xf32>
    %14 = vector.extract_strided_slice %1 {offsets = [2, 0], sizes = [1, 128], strides = [1, 1]} : vector<4x128xf32> to vector<1x128xf32>
    %15 = vector.broadcast %13 : vector<8x1xf32> to vector<8x128xf32>
    %16 = vector.broadcast %14 : vector<1x128xf32> to vector<8x128xf32>
    %17 = arith.mulf %15, %16 : vector<8x128xf32>
    %18 = arith.addf %12, %17 : vector<8x128xf32>
    %19 = vector.extract_strided_slice %0 {offsets = [0, 3], sizes = [8, 1], strides = [1, 1]} : vector<8x4xf32> to vector<8x1xf32>
    %20 = vector.extract_strided_slice %1 {offsets = [3, 0], sizes = [1, 128], strides = [1, 1]} : vector<4x128xf32> to vector<1x128xf32>
    %21 = vector.broadcast %19 : vector<8x1xf32> to vector<8x128xf32>
    %22 = vector.broadcast %20 : vector<1x128xf32> to vector<8x128xf32>
    %23 = arith.mulf %21, %22 : vector<8x128xf32>
    %24 = arith.addf %18, %23 : vector<8x128xf32>
    %c0_3 = arith.constant 0 : index
    %c0_4 = arith.constant 0 : index
    %25 = vector.load %arg7[%c0_3, %c0_4] : memref<5x128xf32, #tpu.memory_space<vmem>>, vector<1x128xf32>
    %26 = vector.broadcast %25 : vector<1x128xf32> to vector<8x128xf32>
    %27 = arith.addf %24, %26 : vector<8x128xf32>
    %28 = math.tanh %27 : vector<8x128xf32>
    %29 = arith.truncf %28 : vector<8x128xf32> to vector<8x128xbf16>
    %c0_5 = arith.constant 0 : index
    %c0_6 = arith.constant 0 : index
    %30 = vector.load %arg3[%c0_5, %c0_6] : memref<128x128xbf16, #tpu.memory_space<vmem>>, vector<128x128xbf16>
    %cst = arith.constant dense<0.000000e+00> : vector<8x128xf32>
    %31 = tpu.matmul %29, %30, %cst {dimension_numbers = #tpu.dot_dimension_numbers<[1], [0], [0], [1], [0, 0, 1, 1], [], []>} : vector<8x128xbf16>, vector<128x128xbf16>, vector<8x128xf32> -> vector<8x128xf32>
    %c1 = arith.constant 1 : index
    %c0_7 = arith.constant 0 : index
    %32 = vector.load %arg7[%c1, %c0_7] : memref<5x128xf32, #tpu.memory_space<vmem>>, vector<1x128xf32>
    %33 = vector.broadcast %32 : vector<1x128xf32> to vector<8x128xf32>
    %34 = arith.addf %31, %33 : vector<8x128xf32>
    %35 = math.tanh %34 : vector<8x128xf32>
    %36 = arith.truncf %35 : vector<8x128xf32> to vector<8x128xbf16>
    %c0_8 = arith.constant 0 : index
    %c0_9 = arith.constant 0 : index
    %37 = vector.load %arg4[%c0_8, %c0_9] : memref<128x128xbf16, #tpu.memory_space<vmem>>, vector<128x128xbf16>
    %cst_10 = arith.constant dense<0.000000e+00> : vector<8x128xf32>
    %38 = tpu.matmul %36, %37, %cst_10 {dimension_numbers = #tpu.dot_dimension_numbers<[1], [0], [0], [1], [0, 0, 1, 1], [], []>} : vector<8x128xbf16>, vector<128x128xbf16>, vector<8x128xf32> -> vector<8x128xf32>
    %c2 = arith.constant 2 : index
    %c0_11 = arith.constant 0 : index
    %39 = vector.load %arg7[%c2, %c0_11] : memref<5x128xf32, #tpu.memory_space<vmem>>, vector<1x128xf32>
    %40 = vector.broadcast %39 : vector<1x128xf32> to vector<8x128xf32>
    %41 = arith.addf %38, %40 : vector<8x128xf32>
    %42 = math.tanh %41 : vector<8x128xf32>
    %43 = arith.truncf %42 : vector<8x128xf32> to vector<8x128xbf16>
    %c0_12 = arith.constant 0 : index
    %c0_13 = arith.constant 0 : index
    %44 = vector.load %arg5[%c0_12, %c0_13] : memref<128x128xbf16, #tpu.memory_space<vmem>>, vector<128x128xbf16>
    %cst_14 = arith.constant dense<0.000000e+00> : vector<8x128xf32>
    %45 = tpu.matmul %43, %44, %cst_14 {dimension_numbers = #tpu.dot_dimension_numbers<[1], [0], [0], [1], [0, 0, 1, 1], [], []>} : vector<8x128xbf16>, vector<128x128xbf16>, vector<8x128xf32> -> vector<8x128xf32>
    %c3 = arith.constant 3 : index
    %c0_15 = arith.constant 0 : index
    %46 = vector.load %arg7[%c3, %c0_15] : memref<5x128xf32, #tpu.memory_space<vmem>>, vector<1x128xf32>
    %47 = vector.broadcast %46 : vector<1x128xf32> to vector<8x128xf32>
    %48 = arith.addf %45, %47 : vector<8x128xf32>
    %49 = math.tanh %48 : vector<8x128xf32>
    %50 = arith.truncf %49 : vector<8x128xf32> to vector<8x128xbf16>
    %c0_16 = arith.constant 0 : index
    %c0_17 = arith.constant 0 : index
    %51 = vector.load %arg6[%c0_16, %c0_17] : memref<128x128xbf16, #tpu.memory_space<vmem>>, vector<128x128xbf16>
    %cst_18 = arith.constant dense<0.000000e+00> : vector<8x128xf32>
    %52 = tpu.matmul %50, %51, %cst_18 {dimension_numbers = #tpu.dot_dimension_numbers<[1], [0], [0], [1], [0, 0, 1, 1], [], []>} : vector<8x128xbf16>, vector<128x128xbf16>, vector<8x128xf32> -> vector<8x128xf32>
    %c4 = arith.constant 4 : index
    %c0_19 = arith.constant 0 : index
    %53 = vector.load %arg7[%c4, %c0_19] : memref<5x128xf32, #tpu.memory_space<vmem>>, vector<1x128xf32>
    %54 = vector.broadcast %53 : vector<1x128xf32> to vector<8x128xf32>
    %55 = arith.addf %52, %54 : vector<8x128xf32>
    %c0_20 = arith.constant 0 : index
    %c0_21 = arith.constant 0 : index
    %56 = vector.load %arg8[%c0_20, %c0_21] : memref<8x128xf32, #tpu.memory_space<vmem>>, vector<8x128xf32>
    tpu.vector_store %arg8[%c0_20, %c0_21], %55 {strides = array<i32>} : memref<8x128xf32, #tpu.memory_space<vmem>>, vector<8x128xf32>,
    return
  }
  func.func @transform_0(%arg0: i32) -> (i32, i32) {
    %c0_i32 = arith.constant 0 : i32
    %c0_i32_0 = arith.constant 0 : i32
    return %arg0, %c0_i32 : i32, i32
  }
  func.func @transform_1(%arg0: i32) -> (i32, i32) {
    %c0_i32 = arith.constant 0 : i32
    %c0_i32_0 = arith.constant 0 : i32
    %c0_i32_1 = arith.constant 0 : i32
    return %c0_i32, %c0_i32_0 : i32, i32
  }
  func.func @transform_2(%arg0: i32) -> (i32, i32) {
    %c0_i32 = arith.constant 0 : i32
    %c0_i32_0 = arith.constant 0 : i32
    %c0_i32_1 = arith.constant 0 : i32
    return %c0_i32, %c0_i32_0 : i32, i32
  }
  func.func @transform_3(%arg0: i32) -> (i32, i32) {
    %c0_i32 = arith.constant 0 : i32
    %c0_i32_0 = arith.constant 0 : i32
    %c0_i32_1 = arith.constant 0 : i32
    return %c0_i32, %c0_i32_0 : i32, i32
  }
  func.func @transform_4(%arg0: i32) -> (i32, i32) {
    %c0_i32 = arith.constant 0 : i32
    %c0_i32_0 = arith.constant 0 : i32
    %c0_i32_1 = arith.constant 0 : i32
    return %c0_i32, %c0_i32_0 : i32, i32
  }
  func.func @transform_5(%arg0: i32) -> (i32, i32) {
    %c0_i32 = arith.constant 0 : i32
    %c0_i32_0 = arith.constant 0 : i32
    %c0_i32_1 = arith.constant 0 : i32
    return %c0_i32, %c0_i32_0 : i32, i32
  }
  func.func @transform_6(%arg0: i32) -> (i32, i32) {
    %c0_i32 = arith.constant 0 : i32
    %c0_i32_0 = arith.constant 0 : i32
    %c0_i32_1 = arith.constant 0 : i32
    return %c0_i32, %c0_i32_0 : i32, i32
  }
  func.func @transform_7(%arg0: i32) -> (i32, i32) {
    %c0_i32 = arith.constant 0 : i32
    %c0_i32_0 = arith.constant 0 : i32
    return %arg0, %c0_i32 : i32, i32
  }
}

</mosaic_0001>

<bundles_post_ra>
// kernel: tpu_custom_call.1
= control target key start
LH: loop header
LB: loop body
LE: loop exit
PB: predicated region body
PF: predicated region fallthrough
CT: control target
= control target key end

     0   :  { %s1493_s0 = inlined_call_operand.vmem [shape: f32[16,4], index: 0, kind: input, shape index: {}]   ;;  %s1494_s1 = inlined_call_operand.vmem [shape: f32[4,128], index: 1, kind: input, shape index: {}]   ;;  %s1495_s2 = inlined_call_operand.hbm [shape: bf16[128,128], index: 2, kind: input, shape index: {}]   ;;  %s1496_s3 = inlined_call_operand.hbm [shape: bf16[128,128], index: 3, kind: input, shape index: {}]   ;;  %s1497_s4 = inlined_call_operand.hbm [shape: bf16[128,128], index: 4, kind: input, shape index: {}]   ;;  %s1498_s5 = inlined_call_operand.hbm [shape: bf16[128,128], index: 5, kind: input, shape index: {}]   ;;  %s1499_s6 = inlined_call_operand.vmem [shape: f32[5,128], index: 6, kind: input, shape index: {}]   ;;  %s1500_s7 = inlined_call_operand.hbm [shape: f32[16,128], index: 7, kind: output, shape index: {}]  }
   0x1   :  { %1501 = sst [smem:[#allocation16_spill]] %s1495_s2 }
   0x2   :  { %1502 = sst [smem:[#allocation17_spill]] %s1496_s3 }
   0x3   :  { %12 = vsyncpa [#allocation3], 0 }
   0x4   :  { %13 = vsyncpa [#allocation6], 0 }
   0x5   :  { %14 = vsyncpa [#allocation9], 0 }
   0x6   :  { %15 = vsyncpa [#allocation4], 0 }
   0x7   :  { %17 = vsyncpa [#allocation4 + $0x1], 0  ;;  %s1343_s24 = smov 0   ;;  %s1345_s25 = smov 0  }
   0x8   :  { %s1347_s26 = smov 0   ;;  %s1349_s27 = smov 0  }
   0x9 LB: > { %s1364_s28 = sadd.s32 4294967295, %s1291_s27   ;;  %s815_s29 = sadd.s32 4294967294, %s1291_s27   ;;  %s1291_s27 = sphi %s1349_s27, %s1514_s27   ;;  %s1287_s26 = sphi %s1347_s26, %s1513_s26   ;;  %s1283_s25 = sphi %s1345_s25, %s1512_s25   ;;  %s1279_s24 = sphi %s1343_s24, %s1511_s24  }
   0xa   : > { %s1368_s30 = sadd.s32 1, %s1291_s27   ;;  %s182_s8 = sadd.s32 1, %s1287_s26 }
   0xb   : > { %s179_s9 = ssub.s32 %s1291_s27, %s1368_s30  ;;  %p192_p0 = scmp.ne.s32.totalorder %s1287_s26, %s1283_s25 }
   0xc   : > { %p180_p1 = scmp.eq.s32.totalorder %s179_s9, 0  ;;  %p193_p2 = scmp.eq.s32.totalorder %s1364_s28, 1 }
   0xd   : > { %p198_p3 = scmp.ne.s32.totalorder %s1283_s25, %s1279_s24  ;;  %p199_p4 = scmp.eq.s32.totalorder %s815_s29, 1 }
   0xe   : > { %s1379_s10 = scalar_select %p180_p1, %s1287_s26, %s182_s8  }
   0xf   : > { %p1381_p5 = por %p193_p2, %p192_p0  ;;  %p1385_p6 = por %p199_p4, %p198_p3 }
  0x10   : > { %1503 = sst [smem:[#allocation15_spill]] %s1379_s10  ;;  %p816_p7 = scmp.ge.s32.totalorder %s1291_s27, 1 }
  0x11   : > { %p206_p8 = scmp.lt.s32.totalorder %s1291_s27, 3  ;;  %p1028_p9 = scmp.eq.s32.totalorder %s1364_s28, 0 }
  0x12   : > { %s1507_s3 = sld [smem:[#allocation17_spill]]  ;;  %s1293_s21 = smov [#allocation5]  }
  0x13   : > { %p1392_p10 = pnand %p816_p7, %p206_p8  ;;  %s1508_s2 = sld [smem:[#allocation16_spill]] }
  0x14   : > { %s236_s22 = sshll.u32 %s1293_s21, 4  ;;  %s1294_s23 = smov 64   ;;  %s237_s22 = int_to_ptr.vmem [resolvable:$true] %s236_s22 }
  0x15   : > { %p1011_p11 = pneg %p1392_p10  ;;  %s1295_s29 = smov 4  }
  0x16   : > { %s1296_s8 = smov [#allocation2]   ;;  %s248_s17 = sshll.u32 %s1497_s4, 4  ;;  %s249_s17 = int_to_ptr.hbm [resolvable:$true] %s248_s17 }
  0x17   : > { %p1406_p12 = pnand %p1028_p9, %p1011_p11  ;;  %s222_s9 = sshll.u32 %s1296_s8, 4  ;;  %s223_s9 = int_to_ptr.vmem [resolvable:$true] %s222_s9 }
  0x18   : > { %s234_s16 = sshll.u32 %s1507_s3, 4  ;;  %s1297_s3 = smov [#allocation7]   ;;  %s235_s16 = int_to_ptr.hbm [resolvable:$true] %s234_s16 }
  0x19   : > { %s220_s19 = sshll.u32 %s1508_s2, 4  ;;  %s262_s2 = sshll.u32 %s1498_s5, 4  ;;  %s221_s19 = int_to_ptr.hbm [resolvable:$true] %s220_s19  ;;  %s263_s2 = int_to_ptr.hbm [resolvable:$true] %s262_s2 }
  0x1a   : > { %1017 = dma.hbm_to_vmem [thread:$0]  (!%p1406_p12), %s235_s16, 1024, %s237_s22, [#allocation6], %s1294_s23, %s1294_s23, %s1295_s29  }
  0x1b   : > { %1014 = dma.hbm_to_vmem [thread:$0]  (!%p1406_p12), %s221_s19, 1024, %s223_s9, [#allocation3], %s1294_s23, %s1294_s23, %s1295_s29  }
  0x1c   : > { %s250_s10 = sshll.u32 %s1297_s3, 4  ;;  %s1298_s16 = smov [#allocation8]   ;;  %s251_s10 = int_to_ptr.vmem [resolvable:$true] %s250_s10 }
  0x1d   : > { %1020 = dma.hbm_to_vmem [thread:$0]  (!%p1406_p12), %s249_s17, 1024, %s251_s10, [#allocation6], %s1294_s23, %s1294_s23, %s1295_s29  }
  0x1e   : > { %s264_s22 = sshll.u32 %s1298_s16, 4  ;;  %290 = sbr.rel (%p1392_p10) target bundleno = 747 (0x2eb), region = 48  ;;  %s265_s22 = int_to_ptr.vmem [resolvable:$true] %s264_s22 }
  0x1f   : > { %1023 = dma.hbm_to_vmem [thread:$0]  (!%p1406_p12), %s263_s2, 1024, %s265_s22, [#allocation9], %s1294_s23, %s1294_s23, %s1295_s29  }
  0x23   : > { %1262 = dma.done.wait (%p1028_p9), [#allocation3], 1024  }
  0x24   : > { %1264 = vsyncadd (%p1028_p9), [#allocation3], 4294966272 }
  0x25   : > { %1266 = dma.done.wait (%p1028_p9), [#allocation6], 2048  }
  0x26   : > { %1268 = vsyncadd (%p1028_p9), [#allocation6], 4294965248 }
  0x27   : > { %1270 = dma.done.wait (%p1028_p9), [#allocation9], 1024  }
  0x28   : > { %1272 = vsyncadd (%p1028_p9), [#allocation9], 4294966272  ;;  %p337_p13 = scmp.lt.s32.totalorder %s1364_s28, 1  ;;  %v1299_v0 = vmov 0   ;;  %v1300_v1 = vmov 2   ;;  %v968_v3 = vld [vmem:[#allocation2 + $0x38] sm:$0xff] }
  0x29   : > { %1079 = vset.pattern.permute.xlu0 %v1299_v0  ;;  %1081 = vset.pattern.permute.xlu1 %v1300_v1  ;;  %v1301_v4 = vmov 1   ;;  %v1302_v5 = vmov 3   ;;  %v967_v6 = vld [vmem:[#allocation2 + $0x30] sm:$0xff]  ;;  %v966_v7 = vld [vmem:[#allocation2 + $0x28] sm:$0xff]  ;;  %v965_v8 = vld [vmem:[#allocation2 + $0x20] sm:$0xff]  ;;  %s334_s16 = sand.u32 1, %s1283_s25  }
  0x2a   : > { %s338_s2 = scalar_select %p337_p13, %s1364_s28, 1  ;;  %442 = vmatpush.bf16.msra.mxu0 %v968_v3  ;;  %v964_v9 = vld [vmem:[#allocation2 + $0x18] sm:$0xff]  ;;  %v963_v10 = vld [vmem:[#allocation2 + $0x10] sm:$0xff]  ;;  %v962_v11 = vld [vmem:[#allocation2 + $0x8] sm:$0xff] }
  0x2b   : > { %v961_v12 = vld [vmem:[#allocation2] sm:$0xff]  ;;  %v976_v13 = vld [vmem:[#allocation5 + $0x38] sm:$0xff]  ;;  %v975_v14 = vld [vmem:[#allocation5 + $0x30] sm:$0xff]  ;;  %s958_s22 = sshll.u32 %s1364_s28, 3  ;;  %s700_s9 = scalar_lea.sflag [#allocation4], %s334_s16 }
  0x2c   : > { %s828_s3 = sshll.u32 %s338_s2, 3  ;;  %523 = vmatpush.bf16.msra.mxu1 %v976_v13  ;;  %v342_v17 = vld [vmem:[%s1494_s1] sm:$0xf]  ;;  %v974_v18 = vld [vmem:[#allocation5 + $0x28] sm:$0xff]  ;;  %v972_v28 = vld [vmem:[#allocation5 + $0x18] sm:$0xff]  ;;  %s827_s2 = sshll.u32 %s334_s16, 3 }
  0x2d   : > { %s340_s19 = scalar_lea.vmem %s1493_s0, %s828_s3  ;;  %v348_v19 = vperm.slane %v342_v17, 0  ;;  %v354_v20 = vperm.slane %v342_v17, 1  ;;  %v973_v21 = vld [vmem:[#allocation5 + $0x20] sm:$0xff]  ;;  %v361_v22 = vperm.slane %v342_v17, 2  ;;  %v368_v23 = vperm.slane %v342_v17, 3  ;;  %v971_v38 = vld [vmem:[#allocation5 + $0x10] sm:$0xff]  ;;  %s710_s13 = scalar_lea.hbm %s1500_s7, %s958_s22 }
  0x2e   : > { %v341_v2 = vld [vmem:[%s340_s19] sm:$0xff]  ;;  %443 = vmatpush.bf16.msra.mxu0 %v967_v6  ;;  %v970_v39 = vld [vmem:[#allocation5 + $0x8] sm:$0xff]  ;;  %v984_v41 = vld [vmem:[#allocation7 + $0x38] sm:$0xff]  ;;  %s336_s23 = scalar_lea.vmem [#allocation10], %s827_s2  ;;  %s714_s8 = sshll.u32 %s710_s13, 4  ;;  %s715_s8 = int_to_ptr.hbm [resolvable:$true] %s714_s8 }
  0x2f   : > { %345 = vperm.xlu0 %1079, %v341_v2   ;;  %358 = vperm.xlu1 %1081, %v341_v2   ;;  %v1084_v33 = vld [vmem:[%s1499_s6] ss:$0 sm:$0xff]  ;;  %v983_v42 = vld [vmem:[#allocation7 + $0x30] sm:$0xff]  ;;  %v982_v43 = vld [vmem:[#allocation7 + $0x28] sm:$0xff]  ;;  %s712_s29 = sshll.u32 %s336_s23, 4  ;;  %s1231_s28 = sshra.s32 %s715_s8, 4  ;;  %s713_s29 = int_to_ptr.vmem [resolvable:$true] %s712_s29  ;;  %s1232_s28 = int_to_ptr.hbm [resolvable:$true] %s1231_s28 }
  0x30   : > { %524 = vmatpush.bf16.msra.mxu1 %v975_v14  ;;  %v969_v40 = vld [vmem:[#allocation5] sm:$0xff]  ;;  %604 = vmatpush.bf16.msra.mxu2 %v984_v41  ;;  %v980_v45 = vld [vmem:[#allocation7 + $0x18] sm:$0xff]  ;;  %v979_v52 = vld [vmem:[#allocation7 + $0x10] sm:$0xff]  ;;  %s1233_s14 = scalar_lea.hbm %s1232_s28, 8  ;;  %s1237_s18 = scalar_lea.hbm %s1500_s7, 16 }
  0x31   : > { %v981_v44 = vld [vmem:[#allocation7 + $0x20] sm:$0xff]  ;;  %v978_v53 = vld [vmem:[#allocation7 + $0x8] sm:$0xff]  ;;  %v992_v55 = vld [vmem:[#allocation8 + $0x38] sm:$0xff]  ;;  %p1234_p0 = scmp.ne.s32.totalorder %s1232_s28, %s1233_s14  ;;  %p1238_p3 = scmp.lt.s32.totalorder %s1232_s28, %s1500_s7 }
  0x32   : > { %444 = vmatpush.bf16.msra.mxu0 %v966_v7  ;;  %v1085_v46 = vld [vmem:[%s1499_s6 + $0x1] ss:$0 sm:$0xff]  ;;  %685 = vmatpush.bf16.msra.mxu3 %v992_v55  ;;  %v991_v56 = vld [vmem:[#allocation8 + $0x30] sm:$0xff]  ;;  %v990_v57 = vld [vmem:[#allocation8 + $0x28] sm:$0xff]  ;;  %p1239_p4 = scmp.lt.s32.totalorder %s1237_s18, %s1233_s14 }
  0x33   : > { %v977_v54 = vld [vmem:[#allocation7] sm:$0xff]  ;;  %v988_v59 = vld [vmem:[#allocation8 + $0x18] sm:$0xff]  ;;  %v986_v3 = vld [vmem:[#allocation8 + $0x8] sm:$0xff]  ;;  %p1235_p1 = pnand %p1234_p0, %p1381_p5 }
  0x34   : > { %525 = vmatpush.bf16.msra.mxu1 %v974_v18  ;;  %605 = vmatpush.bf16.msra.mxu2 %v983_v42  ;;  %v989_v58 = vld [vmem:[#allocation8 + $0x20] sm:$0xff]  ;;  %p1240_p7 = por %p1239_p4, %p1238_p3 }
  0x35   : > { %v1086_v60 = vld [vmem:[%s1499_s6 + $0x2] ss:$0 sm:$0xff]  ;;  %p1236_p2 = pneg %p1235_p1 }
  0x36   : > { %445 = vmatpush.bf16.msra.mxu0 %v965_v8  ;;  %686 = vmatpush.bf16.msra.mxu3 %v991_v56 }
  0x37   : > { %1080 = vset.pattern.permute.xlu0 %v1301_v4  ;;  %1082 = vset.pattern.permute.xlu1 %v1302_v5  ;;  %v985_v4 = vld [vmem:[#allocation8] sm:$0xff]  ;;  %p1241_p8 = pnand %p1240_p7, %p1236_p2 }
  0x38   : > { %351 = vperm.xlu0 %1080, %v341_v2   ;;  %365 = vperm.xlu1 %1082, %v341_v2   ;;  %v987_v2 = vld [vmem:[#allocation8 + $0x10] sm:$0xff] }
  0x39   : > { %526 = vmatpush.bf16.msra.mxu1 %v973_v21  ;;  %606 = vmatpush.bf16.msra.mxu2 %v982_v43 }
  0x3a   : > { %446 = vmatpush.bf16.msra.mxu0 %v964_v9  ;;  %687 = vmatpush.bf16.msra.mxu3 %v990_v57 }
  0x3d   : > { %527 = vmatpush.bf16.msra.mxu1 %v972_v28  ;;  %607 = vmatpush.bf16.msra.mxu2 %v981_v44 }
  0x3e   : > { %447 = vmatpush.bf16.msra.mxu0 %v963_v10  ;;  %688 = vmatpush.bf16.msra.mxu3 %v989_v58 }
  0x40   : > { %1083 = vset.pattern.permute.xlu0 %v1302_v5  ;;  %v1087_v5 = vld [vmem:[%s1499_s6 + $0x3] ss:$0 sm:$0xff] }
  0x41   : > { %528 = vmatpush.bf16.msra.mxu1 %v971_v38  ;;  %608 = vmatpush.bf16.msra.mxu2 %v980_v45 }
  0x42   : > { %448 = vmatpush.bf16.msra.mxu0 %v962_v11  ;;  %689 = vmatpush.bf16.msra.mxu3 %v988_v59  ;;  %v1088_v11 = vld [vmem:[%s1499_s6 + $0x4] ss:$0 sm:$0xff] }
  0x45   : > { %529 = vmatpush.bf16.msra.mxu1 %v970_v39  ;;  %609 = vmatpush.bf16.msra.mxu2 %v979_v52 }
  0x46   : > { %449 = vmatpush.bf16.msra.mxu0 %v961_v12  ;;  %690 = vmatpush.bf16.msra.mxu3 %v987_v2 }
  0x49   : > { %530 = vmatpush.bf16.msra.mxu1 %v969_v40  ;;  %610 = vmatpush.bf16.msra.mxu2 %v978_v53 }
  0x4a   : > { %691 = vmatpush.bf16.msra.mxu3 %v986_v3 }
  0x4d   : > { %611 = vmatpush.bf16.msra.mxu2 %v977_v54 }
  0x4e   : > { %692 = vmatpush.bf16.msra.mxu3 %v985_v4 }
  0xa1   : > { %v346_v15 = vpop.permute.xlu0 %345  ;;  %v359_v16 = vpop.permute.xlu1 %358 }
  0xa2   : > { %v349_v26 = vmul.f32 %v348_v19, %v346_v15  ;;  %v362_v29 = vmul.f32 %v361_v22, %v359_v16 }
  0xaa   : > { %v352_v24 = vpop.permute.xlu0 %351  ;;  %v366_v25 = vpop.permute.xlu1 %365 }
  0xab   : > { %v355_v27 = vmul.f32 %v354_v20, %v352_v24  ;;  %v369_v31 = vmul.f32 %v368_v23, %v366_v25 }
  0xad   : > { %v356_v30 = vadd.f32 %v355_v27, %v349_v26 }
  0xaf   : > { %v363_v32 = vadd.f32 %v362_v29, %v356_v30 }
  0xb1   : > { %v370_v34 = vadd.f32 %v369_v31, %v363_v32 }
  0xb3   : > { %v373_v35 = vadd.f32 %v1084_v33, %v370_v34 }
  0xb5   : > { %1089 = vtanh.f32 %v373_v35 }
  0xbb   : > { %v1090_v36 = vpop.eup %1089 }
  0xbc   : > { %v375_v37 = vpack.c.bf16 %v1090_v36, %v1090_v36 }
  0xbe   : > { %450 = vmatmul.bf16.vlgmr.msra.gmra.mxu0 %v375_v37 }
 0x13b   : > { %v451_v47 = vpop.f32.mrf.mxu0 }
 0x13c   : > { %v452_v48 = vadd.f32 %v1085_v46, %v451_v47 }
 0x13e   : > { %1091 = vtanh.f32 %v452_v48 }
 0x143   : > { %v453_v49 = vpop.f32.mrf.mxu0 }
 0x144   : > { %v1092_v50 = vpop.eup %1091 }
 0x145   : > { %v456_v51 = vpack.c.bf16 %v1092_v50, %v1092_v50 }
 0x147   : > { %531 = vmatmul.bf16.vlgmr.msra.gmra.mxu1 %v456_v51 }
 0x1c4   : > { %v532_v61 = vpop.f32.mrf.mxu1 }
 0x1c5   : > { %v533_v62 = vadd.f32 %v1086_v60, %v532_v61 }
 0x1c7   : > { %1093 = vtanh.f32 %v533_v62 }
 0x1cc   : > { %v534_v63 = vpop.f32.mrf.mxu1 }
 0x1cd   : > { %v1094_v0 = vpop.eup %1093 }
 0x1ce   : > { %v537_v1 = vpack.c.bf16 %v1094_v0, %v1094_v0 }
 0x1d0   : > { %612 = vmatmul.bf16.vlgmr.msra.gmra.mxu2 %v537_v1 }
 0x253   : > { %v613_v6 = vpop.f32.mrf.mxu2 }
 0x254   : > { %v614_v7 = vadd.f32 %v1087_v5, %v613_v6 }
 0x256   : > { %1095 = vtanh.f32 %v614_v7 }
 0x25b   : > { %v615_v8 = vpop.f32.mrf.mxu2 }
 0x25c   : > { %v1096_v9 = vpop.eup %1095 }
 0x25d   : > { %v618_v10 = vpack.c.bf16 %v1096_v9, %v1096_v9 }
 0x25f   : > { %693 = vmatmul.bf16.vlgmr.msra.gmra.mxu3 %v618_v10 }
 0x2e2   : > { %v694_v12 = vpop.f32.mrf.mxu3 }
 0x2e3   : > { %v695_v13 = vadd.f32 %v1088_v11, %v694_v12 }
 0x2e5   : > { %698 = vst [vmem:[%s336_s23] sm:$0xff] %v695_v13 }
 0x2e6   : > { %1244 = shalt.err (!%p1241_p8)
}
 0x2e7   : > { %1009 = dma.vmem_to_hbm [thread:$0]  (%p1381_p5), %s713_s29, 128, %s715_s8, %s700_s9  }
 0x2ea   : > { %v696_v14 = vpop.f32.mrf.mxu3 }
 0x2eb PF: > { %p1036_p9 = scmp.ge.s32.totalorder %s1291_s27, 2  ;;  %s726_s16 = sand.u32 1, %s1279_s24  }
 0x2ec   : > { %s727_s2 = scalar_lea.sflag [#allocation4], %s726_s16 }
 0x2ed   : > { %p1025_p10 = pnand %p1036_p9, %p1385_p6 }
 0x2ef   : > { %p1026_p11 = pneg %p1025_p10 }
 0x2f1   : > { %1274 = dma.done.wait (%p1026_p11), %s727_s2, 128  }
 0x2f2   : > { %1276 = vsyncadd (%p1026_p11), %s727_s2, 4294967168  ;;  %s1510_s3 = sld [smem:[#allocation15_spill]]  ;;  %p20_p12 = scmp.ge.s32.totalorder %s1368_s30, 4  }
 0x2f3   : > { %s1511_s24 = smov %s1283_s25  ;;  %s1512_s25 = smov %s1287_s26 }
 0x2f4   : > { %s1514_s27 = smov %s1368_s30  ;;  %22 = sbr.rel (!%p20_p12) target bundleno = 9 (0x9), region = 100 }
 0x2f8   : > { %s1513_s26 = smov %s1510_s3 }
 0x2f9   :  { %733 = vsyncpa [#allocation3], 1 }
 0x2fa   :  { %735 = vsyncpa [#allocation3 + $0x1], 1 }
 0x2fb   :  { %736 = vsyncpa [#allocation6], 1 }
 0x2fc   :  { %737 = vsyncpa [#allocation9], 1 }
 0x2fd   :  { %738 = vsyncpa [#allocation4], 1 }
 0x2fe   :  { %740 = vsyncpa [#allocation4 + $0x1], 1 }

// kernel: tpu_custom_call.1
= control target key start
LH: loop header
LB: loop body
LE: loop exit
PB: predicated region body
PF: predicated region fallthrough
CT: control target
= control target key end

     0   :  { %s1493_s0 = inlined_call_operand.vmem [shape: f32[16,4], index: 0, kind: input, shape index: {}]   ;;  %s1494_s1 = inlined_call_operand.vmem [shape: f32[4,128], index: 1, kind: input, shape index: {}]   ;;  %s1495_s2 = inlined_call_operand.hbm [shape: bf16[128,128], index: 2, kind: input, shape index: {}]   ;;  %s1496_s3 = inlined_call_operand.hbm [shape: bf16[128,128], index: 3, kind: input, shape index: {}]   ;;  %s1497_s4 = inlined_call_operand.hbm [shape: bf16[128,128], index: 4, kind: input, shape index: {}]   ;;  %s1498_s5 = inlined_call_operand.hbm [shape: bf16[128,128], index: 5, kind: input, shape index: {}]   ;;  %s1499_s6 = inlined_call_operand.vmem [shape: f32[5,128], index: 6, kind: input, shape index: {}]   ;;  %s1500_s7 = inlined_call_operand.hbm [shape: f32[16,128], index: 7, kind: output, shape index: {}]  }
   0x1   :  { %1501 = sst [smem:[#allocation16_spill]] %s1495_s2 }
   0x2   :  { %1502 = sst [smem:[#allocation17_spill]] %s1496_s3 }
   0x3   :  { %12 = vsyncpa [#allocation3], 0 }
   0x4   :  { %13 = vsyncpa [#allocation6], 0 }
   0x5   :  { %14 = vsyncpa [#allocation9], 0 }
   0x6   :  { %15 = vsyncpa [#allocation4], 0 }
   0x7   :  { %17 = vsyncpa [#allocation4 + $0x1], 0  ;;  %s1343_s24 = smov 0   ;;  %s1345_s25 = smov 0  }
   0x8   :  { %s1347_s26 = smov 0   ;;  %s1349_s27 = smov 0  }
   0x9 LB: > { %s1364_s28 = sadd.s32 4294967295, %s1291_s27   ;;  %s815_s29 = sadd.s32 4294967294, %s1291_s27   ;;  %s1291_s27 = sphi %s1349_s27, %s1514_s27   ;;  %s1287_s26 = sphi %s1347_s26, %s1513_s26   ;;  %s1283_s25 = sphi %s1345_s25, %s1512_s25   ;;  %s1279_s24 = sphi %s1343_s24, %s1511_s24  }
   0xa   : > { %s1368_s30 = sadd.s32 1, %s1291_s27   ;;  %s182_s8 = sadd.s32 1, %s1287_s26 }
   0xb   : > { %s179_s9 = ssub.s32 %s1291_s27, %s1368_s30  ;;  %p192_p0 = scmp.ne.s32.totalorder %s1287_s26, %s1283_s25 }
   0xc   : > { %p180_p1 = scmp.eq.s32.totalorder %s179_s9, 0  ;;  %p193_p2 = scmp.eq.s32.totalorder %s1364_s28, 1 }
   0xd   : > { %p198_p3 = scmp.ne.s32.totalorder %s1283_s25, %s1279_s24  ;;  %p199_p4 = scmp.eq.s32.totalorder %s815_s29, 1 }
   0xe   : > { %s1379_s10 = scalar_select %p180_p1, %s1287_s26, %s182_s8  }
   0xf   : > { %p1381_p5 = por %p193_p2, %p192_p0  ;;  %p1385_p6 = por %p199_p4, %p198_p3 }
  0x10   : > { %1503 = sst [smem:[#allocation15_spill]] %s1379_s10  ;;  %p816_p7 = scmp.ge.s32.totalorder %s1291_s27, 1 }
  0x11   : > { %p206_p8 = scmp.lt.s32.totalorder %s1291_s27, 3  ;;  %p1028_p9 = scmp.eq.s32.totalorder %s1364_s28, 0 }
  0x12   : > { %s1507_s3 = sld [smem:[#allocation17_spill]]  ;;  %s1293_s21 = smov [#allocation5]  }
  0x13   : > { %p1392_p10 = pnand %p816_p7, %p206_p8  ;;  %s1508_s2 = sld [smem:[#allocation16_spill]] }
  0x14   : > { %s236_s22 = sshll.u32 %s1293_s21, 4  ;;  %s1294_s23 = smov 64   ;;  %s237_s22 = int_to_ptr.vmem [resolvable:$true] %s236_s22 }
  0x15   : > { %p1011_p11 = pneg %p1392_p10  ;;  %s1295_s29 = smov 4  }
  0x16   : > { %s1296_s8 = smov [#allocation2]   ;;  %s248_s17 = sshll.u32 %s1497_s4, 4  ;;  %s249_s17 = int_to_ptr.hbm [resolvable:$true] %s248_s17 }
  0x17   : > { %p1406_p12 = pnand %p1028_p9, %p1011_p11  ;;  %s222_s9 = sshll.u32 %s1296_s8, 4  ;;  %s223_s9 = int_to_ptr.vmem [resolvable:$true] %s222_s9 }
  0x18   : > { %s234_s16 = sshll.u32 %s1507_s3, 4  ;;  %s1297_s3 = smov [#allocation7]   ;;  %s235_s16 = int_to_ptr.hbm [resolvable:$true] %s234_s16 }
  0x19   : > { %s220_s19 = sshll.u32 %s1508_s2, 4  ;;  %s262_s2 = sshll.u32 %s1498_s5, 4  ;;  %s221_s19 = int_to_ptr.hbm [resolvable:$true] %s220_s19  ;;  %s263_s2 = int_to_ptr.hbm [resolvable:$true] %s262_s2 }
  0x1a   : > { %1017 = dma.hbm_to_vmem [thread:$0]  (!%p1406_p12), %s235_s16, 1024, %s237_s22, [#allocation6], %s1294_s23, %s1294_s23, %s1295_s29  }
  0x1b   : > { %1014 = dma.hbm_to_vmem [thread:$0]  (!%p1406_p12), %s221_s19, 1024, %s223_s9, [#allocation3], %s1294_s23, %s1294_s23, %s1295_s29  }
  0x1c   : > { %s250_s10 = sshll.u32 %s1297_s3, 4  ;;  %s1298_s16 = smov [#allocation8]   ;;  %s251_s10 = int_to_ptr.vmem [resolvable:$true] %s250_s10 }
  0x1d   : > { %1020 = dma.hbm_to_vmem [thread:$0]  (!%p1406_p12), %s249_s17, 1024, %s251_s10, [#allocation6], %s1294_s23, %s1294_s23, %s1295_s29  }
  0x1e   : > { %s264_s22 = sshll.u32 %s1298_s16, 4  ;;  %290 = sbr.rel (%p1392_p10) target bundleno = 747 (0x2eb), region = 48  ;;  %s265_s22 = int_to_ptr.vmem [resolvable:$true] %s264_s22 }
  0x1f   : > { %1023 = dma.hbm_to_vmem [thread:$0]  (!%p1406_p12), %s263_s2, 1024, %s265_s22, [#allocation9], %s1294_s23, %s1294_s23, %s1295_s29  }
  0x23   : > { %1262 = dma.done.wait (%p1028_p9), [#allocation3], 1024  }
  0x24   : > { %1264 = vsyncadd (%p1028_p9), [#allocation3], 4294966272 }
  0x25   : > { %1266 = dma.done.wait (%p1028_p9), [#allocation6], 2048  }
  0x26   : > { %1268 = vsyncadd (%p1028_p9), [#allocation6], 4294965248 }
  0x27   : > { %1270 = dma.done.wait (%p1028_p9), [#allocation9], 1024  }
  0x28   : > { %1272 = vsyncadd (%p1028_p9), [#allocation9], 4294966272  ;;  %p337_p13 = scmp.lt.s32.totalorder %s1364_s28, 1  ;;  %v1299_v0 = vmov 0   ;;  %v1300_v1 = vmov 2   ;;  %v968_v3 = vld [vmem:[#allocation2 + $0x38] sm:$0xff] }
  0x29   : > { %1079 = vset.pattern.permute.xlu0 %v1299_v0  ;;  %1081 = vset.pattern.permute.xlu1 %v1300_v1  ;;  %v1301_v4 = vmov 1   ;;  %v1302_v5 = vmov 3   ;;  %v967_v6 = vld [vmem:[#allocation2 + $0x30] sm:$0xff]  ;;  %v966_v7 = vld [vmem:[#allocation2 + $0x28] sm:$0xff]  ;;  %v965_v8 = vld [vmem:[#allocation2 + $0x20] sm:$0xff]  ;;  %s334_s16 = sand.u32 1, %s1283_s25  }
  0x2a   : > { %s338_s2 = scalar_select %p337_p13, %s1364_s28, 1  ;;  %442 = vmatpush.bf16.msra.mxu0 %v968_v3  ;;  %v964_v9 = vld [vmem:[#allocation2 + $0x18] sm:$0xff]  ;;  %v963_v10 = vld [vmem:[#allocation2 + $0x10] sm:$0xff]  ;;  %v962_v11 = vld [vmem:[#allocation2 + $0x8] sm:$0xff] }
  0x2b   : > { %v961_v12 = vld [vmem:[#allocation2] sm:$0xff]  ;;  %v976_v13 = vld [vmem:[#allocation5 + $0x38] sm:$0xff]  ;;  %v975_v14 = vld [vmem:[#allocation5 + $0x30] sm:$0xff]  ;;  %s958_s22 = sshll.u32 %s1364_s28, 3  ;;  %s700_s9 = scalar_lea.sflag [#allocation4], %s334_s16 }
  0x2c   : > { %s828_s3 = sshll.u32 %s338_s2, 3  ;;  %523 = vmatpush.bf16.msra.mxu1 %v976_v13  ;;  %v342_v17 = vld [vmem:[%s1494_s1] sm:$0xf]  ;;  %v974_v18 = vld [vmem:[#allocation5 + $0x28] sm:$0xff]  ;;  %v972_v28 = vld [vmem:[#allocation5 + $0x18] sm:$0xff]  ;;  %s827_s2 = sshll.u32 %s334_s16, 3 }
  0x2d   : > { %s340_s19 = scalar_lea.vmem %s1493_s0, %s828_s3  ;;  %v348_v19 = vperm.slane %v342_v17, 0  ;;  %v354_v20 = vperm.slane %v342_v17, 1  ;;  %v973_v21 = vld [vmem:[#allocation5 + $0x20] sm:$0xff]  ;;  %v361_v22 = vperm.slane %v342_v17, 2  ;;  %v368_v23 = vperm.slane %v342_v17, 3  ;;  %v971_v38 = vld [vmem:[#allocation5 + $0x10] sm:$0xff]  ;;  %s710_s13 = scalar_lea.hbm %s1500_s7, %s958_s22 }
  0x2e   : > { %v341_v2 = vld [vmem:[%s340_s19] sm:$0xff]  ;;  %443 = vmatpush.bf16.msra.mxu0 %v967_v6  ;;  %v970_v39 = vld [vmem:[#allocation5 + $0x8] sm:$0xff]  ;;  %v984_v41 = vld [vmem:[#allocation7 + $0x38] sm:$0xff]  ;;  %s336_s23 = scalar_lea.vmem [#allocation10], %s827_s2  ;;  %s714_s8 = sshll.u32 %s710_s13, 4  ;;  %s715_s8 = int_to_ptr.hbm [resolvable:$true] %s714_s8 }
  0x2f   : > { %345 = vperm.xlu0 %1079, %v341_v2   ;;  %358 = vperm.xlu1 %1081, %v341_v2   ;;  %v1084_v33 = vld [vmem:[%s1499_s6] ss:$0 sm:$0xff]  ;;  %v983_v42 = vld [vmem:[#allocation7 + $0x30] sm:$0xff]  ;;  %v982_v43 = vld [vmem:[#allocation7 + $0x28] sm:$0xff]  ;;  %s712_s29 = sshll.u32 %s336_s23, 4  ;;  %s1231_s28 = sshra.s32 %s715_s8, 4  ;;  %s713_s29 = int_to_ptr.vmem [resolvable:$true] %s712_s29  ;;  %s1232_s28 = int_to_ptr.hbm [resolvable:$true] %s1231_s28 }
  0x30   : > { %524 = vmatpush.bf16.msra.mxu1 %v975_v14  ;;  %v969_v40 = vld [vmem:[#allocation5] sm:$0xff]  ;;  %604 = vmatpush.bf16.msra.mxu2 %v984_v41  ;;  %v980_v45 = vld [vmem:[#allocation7 + $0x18] sm:$0xff]  ;;  %v979_v52 = vld [vmem:[#allocation7 + $0x10] sm:$0xff]  ;;  %s1233_s14 = scalar_lea.hbm %s1232_s28, 8  ;;  %s1237_s18 = scalar_lea.hbm %s1500_s7, 16 }
  0x31   : > { %v981_v44 = vld [vmem:[#allocation7 + $0x20] sm:$0xff]  ;;  %v978_v53 = vld [vmem:[#allocation7 + $0x8] sm:$0xff]  ;;  %v992_v55 = vld [vmem:[#allocation8 + $0x38] sm:$0xff]  ;;  %p1234_p0 = scmp.ne.s32.totalorder %s1232_s28, %s1233_s14  ;;  %p1238_p3 = scmp.lt.s32.totalorder %s1232_s28, %s1500_s7 }
  0x32   : > { %444 = vmatpush.bf16.msra.mxu0 %v966_v7  ;;  %v1085_v46 = vld [vmem:[%s1499_s6 + $0x1] ss:$0 sm:$0xff]  ;;  %685 = vmatpush.bf16.msra.mxu3 %v992_v55  ;;  %v991_v56 = vld [vmem:[#allocation8 + $0x30] sm:$0xff]  ;;  %v990_v57 = vld [vmem:[#allocation8 + $0x28] sm:$0xff]  ;;  %p1239_p4 = scmp.lt.s32.totalorder %s1237_s18, %s1233_s14 }
  0x33   : > { %v977_v54 = vld [vmem:[#allocation7] sm:$0xff]  ;;  %v988_v59 = vld [vmem:[#allocation8 + $0x18] sm:$0xff]  ;;  %v986_v3 = vld [vmem:[#allocation8 + $0x8] sm:$0xff]  ;;  %p1235_p1 = pnand %p1234_p0, %p1381_p5 }
  0x34   : > { %525 = vmatpush.bf16.msra.mxu1 %v974_v18  ;;  %605 = vmatpush.bf16.msra.mxu2 %v983_v42  ;;  %v989_v58 = vld [vmem:[#allocation8 + $0x20] sm:$0xff]  ;;  %p1240_p7 = por %p1239_p4, %p1238_p3 }
  0x35   : > { %v1086_v60 = vld [vmem:[%s1499_s6 + $0x2] ss:$0 sm:$0xff]  ;;  %p1236_p2 = pneg %p1235_p1 }
  0x36   : > { %445 = vmatpush.bf16.msra.mxu0 %v965_v8  ;;  %686 = vmatpush.bf16.msra.mxu3 %v991_v56 }
  0x37   : > { %1080 = vset.pattern.permute.xlu0 %v1301_v4  ;;  %1082 = vset.pattern.permute.xlu1 %v1302_v5  ;;  %v985_v4 = vld [vmem:[#allocation8] sm:$0xff]  ;;  %p1241_p8 = pnand %p1240_p7, %p1236_p2 }
  0x38   : > { %351 = vperm.xlu0 %1080, %v341_v2   ;;  %365 = vperm.xlu1 %1082, %v341_v2   ;;  %v987_v2 = vld [vmem:[#allocation8 + $0x10] sm:$0xff] }
  0x39   : > { %526 = vmatpush.bf16.msra.mxu1 %v973_v21  ;;  %606 = vmatpush.bf16.msra.mxu2 %v982_v43 }
  0x3a   : > { %446 = vmatpush.bf16.msra.mxu0 %v964_v9  ;;  %687 = vmatpush.bf16.msra.mxu3 %v990_v57 }
  0x3d   : > { %527 = vmatpush.bf16.msra.mxu1 %v972_v28  ;;  %607 = vmatpush.bf16.msra.mxu2 %v981_v44 }
  0x3e   : > { %447 = vmatpush.bf16.msra.mxu0 %v963_v10  ;;  %688 = vmatpush.bf16.msra.mxu3 %v989_v58 }
  0x40   : > { %1083 = vset.pattern.permute.xlu0 %v1302_v5  ;;  %v1087_v5 = vld [vmem:[%s1499_s6 + $0x3] ss:$0 sm:$0xff] }
  0x41   : > { %528 = vmatpush.bf16.msra.mxu1 %v971_v38  ;;  %608 = vmatpush.bf16.msra.mxu2 %v980_v45 }
  0x42   : > { %448 = vmatpush.bf16.msra.mxu0 %v962_v11  ;;  %689 = vmatpush.bf16.msra.mxu3 %v988_v59  ;;  %v1088_v11 = vld [vmem:[%s1499_s6 + $0x4] ss:$0 sm:$0xff] }
  0x45   : > { %529 = vmatpush.bf16.msra.mxu1 %v970_v39  ;;  %609 = vmatpush.bf16.msra.mxu2 %v979_v52 }
  0x46   : > { %449 = vmatpush.bf16.msra.mxu0 %v961_v12  ;;  %690 = vmatpush.bf16.msra.mxu3 %v987_v2 }
  0x49   : > { %530 = vmatpush.bf16.msra.mxu1 %v969_v40  ;;  %610 = vmatpush.bf16.msra.mxu2 %v978_v53 }
  0x4a   : > { %691 = vmatpush.bf16.msra.mxu3 %v986_v3 }
  0x4d   : > { %611 = vmatpush.bf16.msra.mxu2 %v977_v54 }
  0x4e   : > { %692 = vmatpush.bf16.msra.mxu3 %v985_v4 }
  0xa1   : > { %v346_v15 = vpop.permute.xlu0 %345  ;;  %v359_v16 = vpop.permute.xlu1 %358 }
  0xa2   : > { %v349_v26 = vmul.f32 %v348_v19, %v346_v15  ;;  %v362_v29 = vmul.f32 %v361_v22, %v359_v16 }
  0xaa   : > { %v352_v24 = vpop.permute.xlu0 %351  ;;  %v366_v25 = vpop.permute.xlu1 %365 }
  0xab   : > { %v355_v27 = vmul.f32 %v354_v20, %v352_v24  ;;  %v369_v31 = vmul.f32 %v368_v23, %v366_v25 }
  0xad   : > { %v356_v30 = vadd.f32 %v355_v27, %v349_v26 }
  0xaf   : > { %v363_v32 = vadd.f32 %v362_v29, %v356_v30 }
  0xb1   : > { %v370_v34 = vadd.f32 %v369_v31, %v363_v32 }
  0xb3   : > { %v373_v35 = vadd.f32 %v1084_v33, %v370_v34 }
  0xb5   : > { %1089 = vtanh.f32 %v373_v35 }
  0xbb   : > { %v1090_v36 = vpop.eup %1089 }
  0xbc   : > { %v375_v37 = vpack.c.bf16 %v1090_v36, %v1090_v36 }
  0xbe   : > { %450 = vmatmul.bf16.vlgmr.msra.gmra.mxu0 %v375_v37 }
 0x13b   : > { %v451_v47 = vpop.f32.mrf.mxu0 }
 0x13c   : > { %v452_v48 = vadd.f32 %v1085_v46, %v451_v47 }
 0x13e   : > { %1091 = vtanh.f32 %v452_v48 }
 0x143   : > { %v453_v49 = vpop.f32.mrf.mxu0 }
 0x144   : > { %v1092_v50 = vpop.eup %1091 }
 0x145   : > { %v456_v51 = vpack.c.bf16 %v1092_v50, %v1092_v50 }
 0x147   : > { %531 = vmatmul.bf16.vlgmr.msra.gmra.mxu1 %v456_v51 }
 0x1c4   : > { %v532_v61 = vpop.f32.mrf.mxu1 }
 0x1c5   : > { %v533_v62 = vadd.f32 %v1086_v60, %v532_v61 }
 0x1c7   : > { %1093 = vtanh.f32 %v533_v62 }
 0x1cc   : > { %v534_v63 = vpop.f32.mrf.mxu1 }
 0x1cd   : > { %v1094_v0 = vpop.eup %1093 }
 0x1ce   : > { %v537_v1 = vpack.c.bf16 %v1094_v0, %v1094_v0 }
 0x1d0   : > { %612 = vmatmul.bf16.vlgmr.msra.gmra.mxu2 %v537_v1 }
 0x253   : > { %v613_v6 = vpop.f32.mrf.mxu2 }
 0x254   : > { %v614_v7 = vadd.f32 %v1087_v5, %v613_v6 }
 0x256   : > { %1095 = vtanh.f32 %v614_v7 }
 0x25b   : > { %v615_v8 = vpop.f32.mrf.mxu2 }
 0x25c   : > { %v1096_v9 = vpop.eup %1095 }
 0x25d   : > { %v618_v10 = vpack.c.bf16 %v1096_v9, %v1096_v9 }
 0x25f   : > { %693 = vmatmul.bf16.vlgmr.msra.gmra.mxu3 %v618_v10 }
 0x2e2   : > { %v694_v12 = vpop.f32.mrf.mxu3 }
 0x2e3   : > { %v695_v13 = vadd.f32 %v1088_v11, %v694_v12 }
 0x2e5   : > { %698 = vst [vmem:[%s336_s23] sm:$0xff] %v695_v13 }
 0x2e6   : > { %1244 = shalt.err (!%p1241_p8)
}
 0x2e7   : > { %1009 = dma.vmem_to_hbm [thread:$0]  (%p1381_p5), %s713_s29, 128, %s715_s8, %s700_s9  }
 0x2ea   : > { %v696_v14 = vpop.f32.mrf.mxu3 }
 0x2eb PF: > { %p1036_p9 = scmp.ge.s32.totalorder %s1291_s27, 2  ;;  %s726_s16 = sand.u32 1, %s1279_s24  }
 0x2ec   : > { %s727_s2 = scalar_lea.sflag [#allocation4], %s726_s16 }
 0x2ed   : > { %p1025_p10 = pnand %p1036_p9, %p1385_p6 }
 0x2ef   : > { %p1026_p11 = pneg %p1025_p10 }
 0x2f1   : > { %1274 = dma.done.wait (%p1026_p11), %s727_s2, 128  }
 0x2f2   : > { %1276 = vsyncadd (%p1026_p11), %s727_s2, 4294967168  ;;  %s1510_s3 = sld [smem:[#allocation15_spill]]  ;;  %p20_p12 = scmp.ge.s32.totalorder %s1368_s30, 4  }
 0x2f3   : > { %s1511_s24 = smov %s1283_s25  ;;  %s1512_s25 = smov %s1287_s26 }
 0x2f4   : > { %s1514_s27 = smov %s1368_s30  ;;  %22 = sbr.rel (!%p20_p12) target bundleno = 9 (0x9), region = 100 }
 0x2f8   : > { %s1513_s26 = smov %s1510_s3 }
 0x2f9   :  { %733 = vsyncpa [#allocation3], 1 }
 0x2fa   :  { %735 = vsyncpa [#allocation3 + $0x1], 1 }
 0x2fb   :  { %736 = vsyncpa [#allocation6], 1 }
 0x2fc   :  { %737 = vsyncpa [#allocation9], 1 }
 0x2fd   :  { %738 = vsyncpa [#allocation4], 1 }
 0x2fe   :  { %740 = vsyncpa [#allocation4 + $0x1], 1 }

</bundles_post_ra>
